<compile_context>
chip_gen: v5e
topology: v5e:2x2
jax: 0.10.0
libtpu: 0.0.40
codegen_flags: <defaults>
</compile_context>

<pallas_src>
import functools
import numpy as np
import jax
import jax.numpy as jnp
from jax.experimental import pallas as pl
from jax.experimental.pallas import tpu as pltpu

EPS = float(np.finfo(np.float32).eps)
F_PAD = 128      # padded filterbank(+energy) column count  (lane-dense)
C_PAD = 128      # padded [lfcc | lfb] feature column count  (lane-dense stores)


# ----------------------------- parameter glue -------------------------------

def _round_up(x, m):
    return -(-x // m) * m


def _pick_tile(t, b):
    """Time tile: as large as possible (<=1024 frames, sublane multiple) while
    keeping >= 2 total grid steps (megacore / pipelining)."""
    tt = min(1024, _round_up(t, 8))
    if b < 2 and t > 8:
        tt = min(tt, _round_up(-(-t // 2), 8))
    return tt


def hamming_window(win_length):
    n = np.arange(win_length)
    return (0.54 - 0.46 * np.cos(2.0 * np.pi * n / win_length)).astype(np.float32)


def dft_weight(n_fft, win, n_freq_pad):
    """Window-folded real/imag DFT weights, concatenated: (n_fft, 2*n_freq_pad)."""
    n_freq = n_fft // 2 + 1
    n = np.arange(n_fft)[:, None].astype(np.float64)
    k = np.arange(n_freq)[None, :].astype(np.float64)
    ang = 2.0 * np.pi * n * k / n_fft
    w = np.zeros((n_fft, 2 * n_freq_pad), np.float32)
    w[:, :n_freq] = (np.cos(ang) * win[:, None].astype(np.float64)).astype(np.float32)
    w[:, n_freq_pad:n_freq_pad + n_freq] = (
        np.sin(ang) * win[:, None].astype(np.float64)).astype(np.float32)
    return w


def fb_energy_weight(sample_rate, n_fft, n_filters, n_freq_pad):
    """Linear triangular filterbank + energy column, zero-padded to F_PAD columns."""
    n_freq = n_fft // 2 + 1
    f = np.linspace(0.0, sample_rate / 2.0, n_freq)
    bands = np.linspace(f.min(), f.max(), n_filters + 2)
    w = np.zeros((n_freq_pad, F_PAD), np.float32)
    for i in range(n_filters):
        a, b, c = bands[i], bands[i + 1], bands[i + 2]
        up = (f - a) / max(b - a, 1e-12)
        down = (c - f) / max(c - b, 1e-12)
        w[:n_freq, i] = np.maximum(0.0, np.minimum(up, down))
    w[:n_freq, n_filters] = 1.0 / n_fft          # energy = sum(power)/n_fft
    return w


def dct_matrix(n):
    # orthonormal DCT-II, applied as  lfcc = log_fb @ D
    m = np.arange(n)[:, None].astype(np.float64)
    k = np.arange(n)[None, :].astype(np.float64)
    d = np.cos(np.pi * (m + 0.5) * k / n) * np.sqrt(2.0 / n)
    d[:, 0] *= 1.0 / np.sqrt(2.0)
    return d.astype(np.float32)


def post_projection(n_bins):
    """(F_PAD, C_PAD) map: [log_fb | log_energy | 0..] -> [lfcc(energy at 0) | lfb | 0..]."""
    d = dct_matrix(n_bins)
    p = np.zeros((F_PAD, C_PAD), np.float32)
    p[:n_bins, :n_bins] = d
    p[:n_bins, 0] = 0.0                                     # DCT coef 0 removed ...
    p[n_bins, 0] = 1.0                                      # ... replaced by log energy
    p[:n_bins, n_bins:2 * n_bins] = np.eye(n_bins, dtype=np.float32)   # pass-through LFB
    return p


# ------------------------------- kernels -------------------------------------

def _feat_kernel(xh_ref, dftlo_ref, dfthi_ref, fbe_ref, proj_ref, out_ref, *,
                 ttf, n_freq_pad):
    t0 = pl.multiple_of(pl.program_id(1) * ttf, 8)
    # one aligned read of ttf+8 hop-blocks; frame t = [block t | block t+1]
    blk = xh_ref[pl.ds(t0, ttf + 8), :]                      # (ttf+8, hop) f32
    lo = blk[:ttf].astype(jnp.bfloat16)                      # (ttf, hop)
    hi = blk[1:ttf + 1].astype(jnp.bfloat16)                 # (ttf, hop)

    # window-folded DFT, split into the two hop halves (avoids a lane concat)
    spec = (jnp.dot(lo, dftlo_ref[...], preferred_element_type=jnp.float32) +
            jnp.dot(hi, dfthi_ref[...], preferred_element_type=jnp.float32))
    re = spec[:, :n_freq_pad]
    im = spec[:, n_freq_pad:]
    power = re * re + im * im                                # |X|^2, f32

    # filterbank + energy column -> log10  (shared by LFB and LFCC)
    fb = jnp.dot(power.astype(jnp.bfloat16), fbe_ref[...],
                 preferred_element_type=jnp.float32)         # (ttf, F_PAD)
    logfb = jnp.log10(fb + EPS)

    # DCT-II + coef-0 energy substitution + [lfcc | lfb] concat, one matmul
    # (kept f32: negligible FLOPs, preserves feature precision for the deltas)
    out_ref[...] = jnp.dot(logfb, proj_ref[...],
                           preferred_element_type=jnp.float32)   # (ttf, C_PAD)


def _mix_kernel(sp_ref, ws_ref, wd_ref, wdd_ref, b_ref, g_ref, beta_ref, o_ref, *, ttm):
    t0 = pl.multiple_of(pl.program_id(1) * ttm, 8)
    # one aligned read of the (extrapolated) 2-frame halo window; all stencil
    # taps are static sublane-offset slices of the same value (no concats).
    blk = sp_ref[pl.ds(t0, ttm + 8), :]                      # (ttm+8, C_PAD)
    sm2 = blk[0:ttm]
    sm1 = blk[1:ttm + 1]
    s = blk[2:ttm + 2]
    sp1 = blk[3:ttm + 3]
    sp2 = blk[4:ttm + 4]
    d = sp1 - sm1                                            # delta (replicate edges)
    dd = sp2 - 2.0 * s + sm2                                 # delta-delta (via extrap. halo)

    # fused fc (pre-split weights, three K=C_PAD matmuls) -> LayerNorm -> SiLU
    y = (jnp.dot(s, ws_ref[...], preferred_element_type=jnp.float32) +
         jnp.dot(d, wd_ref[...], preferred_element_type=jnp.float32) +
         jnp.dot(dd, wdd_ref[...], preferred_element_type=jnp.float32) +
         b_ref[...])
    mu = jnp.mean(y, axis=-1, keepdims=True)
    var = jnp.mean((y - mu) ** 2, axis=-1, keepdims=True)
    ln = (y - mu) * jax.lax.rsqrt(var + 1e-5) * g_ref[...] + beta_ref[...]
    o_ref[...] = ln * jax.nn.sigmoid(ln)


# ------------------------------- wrapper --------------------------------------

def lfcc_lfb_linear(x, fc_w, fc_b, ln_g, ln_b, *,
                    sample_rate, n_bins, n_fft, win_length, hop):
    B, L = x.shape
    assert n_fft == 2 * hop, "in-kernel framing assumes n_fft == 2*hop"
    # TODO(synk): generic hop (n_fft != 2*hop) needs a different in-kernel framing.
    x = x.astype(jnp.float32)

    # pre-emphasis (with_emphasis=True) — cheap elementwise, stays in XLA
    x = jnp.concatenate([x[:, :1], x[:, 1:] - 0.97 * x[:, :-1]], axis=1)

    pad = n_fft // 2
    Lp = L + 2 * pad
    T = 1 + (Lp - n_fft) // hop          # == 1 + L // hop (torch.stft center=True)
    assert T >= 2

    n_freq_pad = _round_up(n_fft // 2 + 1, 128)
    C = 2 * n_bins
    out_dim = 3 * n_bins
    assert C <= C_PAD and n_bins + 1 <= F_PAD

    # -------- stage 1: audio -> power spectrum -> log filterbank -> [lfcc | lfb]
    ttf = _pick_tile(T, B)
    n_tf = -(-T // ttf)
    t_pad = n_tf * ttf
    nb_pad = t_pad + 8                   # hop-blocks; +8 so aligned (ttf+8)-row reads fit

    # hop-blocked, centered, zero-padded audio (read from HBM once per batch)
    total = nb_pad * hop
    xp = jnp.pad(x, ((0, 0), (pad, max(0, total - pad - L))))[:, :total]
    xh = xp.reshape(B, nb_pad, hop)

    win = np.zeros((n_fft,), np.float32)
    off = (n_fft - win_length) // 2
    win[off:off + win_length] = hamming_window(win_length)
    dftw = dft_weight(n_fft, win, n_freq_pad)
    dft_lo = jnp.asarray(dftw[:hop], dtype=jnp.bfloat16)     # (hop, 2*n_freq_pad)
    dft_hi = jnp.asarray(dftw[hop:], dtype=jnp.bfloat16)
    fbe = jnp.asarray(fb_energy_weight(sample_rate, n_fft, n_bins, n_freq_pad),
                      dtype=jnp.bfloat16)                    # (n_freq_pad, F_PAD)
    proj = jnp.asarray(post_projection(n_bins), dtype=jnp.float32)   # (F_PAD, C_PAD)

    stat = pl.pallas_call(
        functools.partial(_feat_kernel, ttf=ttf, n_freq_pad=n_freq_pad),
        out_shape=jax.ShapeDtypeStruct((B, t_pad, C_PAD), jnp.float32),
        grid=(B, n_tf),
        in_specs=[pl.BlockSpec((None, nb_pad, hop), lambda b, t: (b, 0, 0)),
                  pl.BlockSpec((hop, 2 * n_freq_pad), lambda b, t: (0, 0)),
                  pl.BlockSpec((hop, 2 * n_freq_pad), lambda b, t: (0, 0)),
                  pl.BlockSpec((n_freq_pad, F_PAD), lambda b, t: (0, 0)),
                  pl.BlockSpec((F_PAD, C_PAD), lambda b, t: (0, 0))],
        out_specs=pl.BlockSpec((None, ttf, C_PAD), lambda b, t: (b, t, 0)),
        compiler_params=pltpu.CompilerParams(
            dimension_semantics=("parallel", "parallel")),
    )(xh, dft_lo, dft_hi, fbe, proj)

    # -------- XLA glue: 2-frame halo with linearly extrapolated outer rows ----
    # sp[0]=2*s[0]-s[1], sp[1]=s[0], sp[2:T+2]=s, sp[T+2]=s[T-1], sp[T+3]=2*s[T-1]-s[T-2].
    # Then d[t]=sp[t+3]-sp[t+1] and dd[t]=sp[t+4]-2*sp[t+2]+sp[t] equal the
    # replicate-padded width-3 delta applied once / twice, with no edge logic.
    s = stat[:, :T]
    sph = jnp.concatenate(
        [2.0 * s[:, :1] - s[:, 1:2], s[:, :1], s, s[:, -1:],
         2.0 * s[:, -1:] - s[:, -2:-1]], axis=1)             # (B, T+4, C_PAD)

    ttm = _pick_tile(T, B)
    n_tm = -(-T // ttm)
    t_pad_m = n_tm * ttm
    th = t_pad_m + 8
    sph = jnp.pad(sph, ((0, 0), (0, th - (T + 4)), (0, 0)))

    # pre-split fc weight into static / delta / delta-delta groups in the
    # kernel's [lfcc | lfb | zero-pad] column order (removes the old in-kernel
    # feature concat and the row permutation).  Assumed reference column order:
    # [lfcc, d_lfcc, dd_lfcc, lfb, d_lfb, dd_lfb].
    n = n_bins
    wt = jnp.transpose(fc_w)                                 # (6n, out_dim)

    def _grp(a, b):
        w = jnp.concatenate([wt[a * n:(a + 1) * n], wt[b * n:(b + 1) * n]], axis=0)
        return jnp.pad(w, ((0, C_PAD - 2 * n), (0, 0)))      # zero rows for padded cols

    w_s, w_d, w_dd = _grp(0, 3), _grp(1, 4), _grp(2, 5)

    out = pl.pallas_call(
        functools.partial(_mix_kernel, ttm=ttm),
        out_shape=jax.ShapeDtypeStruct((B, t_pad_m, out_dim), jnp.float32),
        grid=(B, n_tm),
        in_specs=[pl.BlockSpec((None, th, C_PAD), lambda b, t: (b, 0, 0)),
                  pl.BlockSpec((C_PAD, out_dim), lambda b, t: (0, 0)),
                  pl.BlockSpec((C_PAD, out_dim), lambda b, t: (0, 0)),
                  pl.BlockSpec((C_PAD, out_dim), lambda b, t: (0, 0)),
                  pl.BlockSpec((1, out_dim), lambda b, t: (0, 0)),
                  pl.BlockSpec((1, out_dim), lambda b, t: (0, 0)),
                  pl.BlockSpec((1, out_dim), lambda b, t: (0, 0))],
        out_specs=pl.BlockSpec((None, ttm, out_dim), lambda b, t: (b, t, 0)),
        compiler_params=pltpu.CompilerParams(
            dimension_semantics=("parallel", "parallel")),
    )(sph, w_s, w_d, w_dd, fc_b[None, :], ln_g[None, :], ln_b[None, :])

    return out[:, :T]


# ------------------------------- main -----------------------------------------

if __name__ == "__main__":
    # small config consistent with the module
    sample_rate, n_bins, coef = 16000, 16, 16
    n_fft, win_length, hop = 128, 128, 64
    B, L = 2, 4096

    key = jax.random.PRNGKey(0)
    kx, kw, kb = jax.random.split(key, 3)
    x = jax.random.normal(kx, (B, L), dtype=jnp.float32) * 0.1

    in_dim, out_dim = 6 * n_bins, 3 * n_bins
    fc_w = jax.random.normal(kw, (out_dim, in_dim), dtype=jnp.float32) / np.sqrt(in_dim)
    fc_b = jax.random.normal(kb, (out_dim,), dtype=jnp.float32) * 0.01
    ln_g = jnp.ones((out_dim,), jnp.float32)
    ln_b = jnp.zeros((out_dim,), jnp.float32)

    # TODO(synk): mix_type='conv' path is unreachable in the reference forward
    # (it asserts), and 'concat' is a trivial concat; only 'linear' is kernelized.
    y = lfcc_lfb_linear(x, fc_w, fc_b, ln_g, ln_b,
                        sample_rate=sample_rate, n_bins=n_bins,
                        n_fft=n_fft, win_length=win_length, hop=hop)
    y = jax.block_until_ready(y)
    assert y.shape == (B, 1 + L // hop, out_dim), y.shape
    assert bool(jnp.all(jnp.isfinite(y)))
    print("KERNEL_OK")
</pallas_src>

<mosaic_0001>
module attributes {stable_mosaic.version = 11 : i64} {
  func.func @_feat_kernel(%arg0: i32, %arg1: i32, %arg2: memref<1x80x64xf32, #tpu.memory_space<vmem>>, %arg3: memref<64x256xbf16, #tpu.memory_space<vmem>>, %arg4: memref<64x256xbf16, #tpu.memory_space<vmem>>, %arg5: memref<128x128xbf16, #tpu.memory_space<vmem>>, %arg6: memref<128x128xf32, #tpu.memory_space<vmem>>, %arg7: memref<1x72x128xf32, #tpu.memory_space<vmem>>) attributes {dimension_semantics = [#tpu.dimension_semantics<parallel>, #tpu.dimension_semantics<parallel>], iteration_bounds = array<i64: 2, 1>, scalar_prefetch = 0 : i64, scratch_operands = 0 : i64, tpu.core_type = #tpu.core_type<tc>, window_params = [{transform_indices = @transform_0, window_bounds = array<i64: 1, 80, 64>}, {pipeline_mode = #tpu.pipeline_mode<synchronous>, transform_indices = @transform_1, window_bounds = array<i64: 64, 256>}, {pipeline_mode = #tpu.pipeline_mode<synchronous>, transform_indices = @transform_2, window_bounds = array<i64: 64, 256>}, {pipeline_mode = #tpu.pipeline_mode<synchronous>, transform_indices = @transform_3, window_bounds = array<i64: 128, 128>}, {pipeline_mode = #tpu.pipeline_mode<synchronous>, transform_indices = @transform_4, window_bounds = array<i64: 128, 128>}, {transform_indices = @transform_5, window_bounds = array<i64: 1, 72, 128>}]} {
    %c72_i32 = arith.constant 72 : i32
    %0 = arith.muli %arg1, %c72_i32 : i32
    %1 = tpu.assume_multiple %0, 8 : i32
    %c0 = arith.constant 0 : index
    %2 = arith.index_cast %1 : i32 to index
    %c0_0 = arith.constant 0 : index
    %3 = vector.load %arg2[%c0, %2, %c0_0] : memref<1x80x64xf32, #tpu.memory_space<vmem>>, vector<1x80x64xf32>
    %4 = vector.shape_cast %3 : vector<1x80x64xf32> to vector<80x64xf32>
    %5 = vector.extract_strided_slice %4 {offsets = [0, 0], sizes = [72, 64], strides = [1, 1]} : vector<80x64xf32> to vector<72x64xf32>
    %6 = arith.truncf %5 : vector<72x64xf32> to vector<72x64xbf16>
    %7 = vector.extract_strided_slice %4 {offsets = [1, 0], sizes = [72, 64], strides = [1, 1]} : vector<80x64xf32> to vector<72x64xf32>
    %8 = arith.truncf %7 : vector<72x64xf32> to vector<72x64xbf16>
    %c0_1 = arith.constant 0 : index
    %c0_2 = arith.constant 0 : index
    %9 = vector.load %arg3[%c0_1, %c0_2] : memref<64x256xbf16, #tpu.memory_space<vmem>>, vector<64x256xbf16>
    %cst = arith.constant dense<0.000000e+00> : vector<72x256xf32>
    %10 = tpu.matmul %6, %9, %cst {dimension_numbers = #tpu.dot_dimension_numbers<[1], [0], [0], [1], [0, 0, 1, 1], [], []>} : vector<72x64xbf16>, vector<64x256xbf16>, vector<72x256xf32> -> vector<72x256xf32>
    %c0_3 = arith.constant 0 : index
    %c0_4 = arith.constant 0 : index
    %11 = vector.load %arg4[%c0_3, %c0_4] : memref<64x256xbf16, #tpu.memory_space<vmem>>, vector<64x256xbf16>
    %cst_5 = arith.constant dense<0.000000e+00> : vector<72x256xf32>
    %12 = tpu.matmul %8, %11, %cst_5 {dimension_numbers = #tpu.dot_dimension_numbers<[1], [0], [0], [1], [0, 0, 1, 1], [], []>} : vector<72x64xbf16>, vector<64x256xbf16>, vector<72x256xf32> -> vector<72x256xf32>
    %13 = arith.addf %10, %12 : vector<72x256xf32>
    %14 = vector.extract_strided_slice %13 {offsets = [0, 0], sizes = [72, 128], strides = [1, 1]} : vector<72x256xf32> to vector<72x128xf32>
    %15 = vector.extract_strided_slice %13 {offsets = [0, 128], sizes = [72, 128], strides = [1, 1]} : vector<72x256xf32> to vector<72x128xf32>
    %16 = arith.mulf %14, %14 : vector<72x128xf32>
    %17 = arith.mulf %15, %15 : vector<72x128xf32>
    %18 = arith.addf %16, %17 : vector<72x128xf32>
    %19 = arith.truncf %18 : vector<72x128xf32> to vector<72x128xbf16>
    %c0_6 = arith.constant 0 : index
    %c0_7 = arith.constant 0 : index
    %20 = vector.load %arg5[%c0_6, %c0_7] : memref<128x128xbf16, #tpu.memory_space<vmem>>, vector<128x128xbf16>
    %cst_8 = arith.constant dense<0.000000e+00> : vector<72x128xf32>
    %21 = tpu.matmul %19, %20, %cst_8 {dimension_numbers = #tpu.dot_dimension_numbers<[1], [0], [0], [1], [0, 0, 1, 1], [], []>} : vector<72x128xbf16>, vector<128x128xbf16>, vector<72x128xf32> -> vector<72x128xf32>
    %cst_9 = arith.constant 1.1920929E-7 : f32
    %22 = vector.broadcast %cst_9 : f32 to vector<72x128xf32>
    %23 = arith.addf %21, %22 : vector<72x128xf32>
    %24 = math.log %23 : vector<72x128xf32>
    %cst_10 = arith.constant 0.434294492 : f32
    %25 = vector.broadcast %cst_10 : f32 to vector<72x128xf32>
    %26 = arith.mulf %24, %25 : vector<72x128xf32>
    %c0_11 = arith.constant 0 : index
    %c0_12 = arith.constant 0 : index
    %27 = vector.load %arg6[%c0_11, %c0_12] : memref<128x128xf32, #tpu.memory_space<vmem>>, vector<128x128xf32>
    %cst_13 = arith.constant dense<0.000000e+00> : vector<72x128xf32>
    %28 = tpu.matmul %26, %27, %cst_13 {dimension_numbers = #tpu.dot_dimension_numbers<[1], [0], [0], [1], [0, 0, 1, 1], [], []>} : vector<72x128xf32>, vector<128x128xf32>, vector<72x128xf32> -> vector<72x128xf32>
    %c0_14 = arith.constant 0 : index
    %c0_15 = arith.constant 0 : index
    %c0_16 = arith.constant 0 : index
    %29 = vector.load %arg7[%c0_14, %c0_15, %c0_16] : memref<1x72x128xf32, #tpu.memory_space<vmem>>, vector<1x72x128xf32>
    %30 = vector.shape_cast %29 : vector<1x72x128xf32> to vector<72x128xf32>
    %31 = vector.shape_cast %28 : vector<72x128xf32> to vector<1x72x128xf32>
    tpu.vector_store %arg7[%c0_14, %c0_15, %c0_16], %31 {strides = array<i32>} : memref<1x72x128xf32, #tpu.memory_space<vmem>>, vector<1x72x128xf32>,
    return
  }
  func.func @transform_0(%arg0: i32, %arg1: i32) -> (i32, i32, i32) {
    %c0_i32 = arith.constant 0 : i32
    %c0_i32_0 = arith.constant 0 : i32
    %c0_i32_1 = arith.constant 0 : i32
    return %arg0, %c0_i32, %c0_i32_0 : i32, i32, i32
  }
  func.func @transform_1(%arg0: i32, %arg1: i32) -> (i32, i32) {
    %c0_i32 = arith.constant 0 : i32
    %c0_i32_0 = arith.constant 0 : i32
    %c0_i32_1 = arith.constant 0 : i32
    return %c0_i32, %c0_i32_0 : i32, i32
  }
  func.func @transform_2(%arg0: i32, %arg1: i32) -> (i32, i32) {
    %c0_i32 = arith.constant 0 : i32
    %c0_i32_0 = arith.constant 0 : i32
    %c0_i32_1 = arith.constant 0 : i32
    return %c0_i32, %c0_i32_0 : i32, i32
  }
  func.func @transform_3(%arg0: i32, %arg1: i32) -> (i32, i32) {
    %c0_i32 = arith.constant 0 : i32
    %c0_i32_0 = arith.constant 0 : i32
    %c0_i32_1 = arith.constant 0 : i32
    return %c0_i32, %c0_i32_0 : i32, i32
  }
  func.func @transform_4(%arg0: i32, %arg1: i32) -> (i32, i32) {
    %c0_i32 = arith.constant 0 : i32
    %c0_i32_0 = arith.constant 0 : i32
    %c0_i32_1 = arith.constant 0 : i32
    return %c0_i32, %c0_i32_0 : i32, i32
  }
  func.func @transform_5(%arg0: i32, %arg1: i32) -> (i32, i32, i32) {
    %c0_i32 = arith.constant 0 : i32
    %c0_i32_0 = arith.constant 0 : i32
    return %arg0, %arg1, %c0_i32 : i32, i32, i32
  }
}

</mosaic_0001>

<bundles_post_ra>
// kernel: tpu_custom_call.1
= control target key start
LH: loop header
LB: loop body
LE: loop exit
PB: predicated region body
PF: predicated region fallthrough
CT: control target
= control target key end

     0   :  { %10 = vsyncpa [#allocation3], 0  ;;  %s1627_s0 = inlined_call_operand.vmem [shape: f32[2,80,64], index: 0, kind: input, shape index: {}]   ;;  %s1628_s1 = inlined_call_operand.vmem [shape: bf16[64,256], index: 1, kind: input, shape index: {}]   ;;  %s1629_s2 = inlined_call_operand.vmem [shape: bf16[64,256], index: 2, kind: input, shape index: {}]   ;;  %s1630_s3 = inlined_call_operand.hbm [shape: bf16[128,128], index: 3, kind: input, shape index: {}]   ;;  %s1631_s4 = inlined_call_operand.vmem [shape: f32[128,128], index: 4, kind: input, shape index: {}]   ;;  %s1632_s5 = inlined_call_operand.hbm [shape: f32[2,72,128], index: 5, kind: output, shape index: {}]  }
   0x1   :  { %11 = vsyncpa [#allocation4], 0 }
   0x2   :  { %13 = vsyncpa [#allocation4 + $0x1], 0  ;;  %s1298_s18 = smov 0   ;;  %s1300_s19 = smov 0  }
   0x3   :  { %s1302_s20 = smov 0   ;;  %s1304_s21 = smov 0  }
   0x4   :  { %s1306_s22 = smov 0   ;;  %s1308_s23 = smov 0  }
   0x5 LB: > { %s899_s24 = sadd.s32 4294967295, %s1261_s23   ;;  %s900_s25 = sadd.s32 4294967294, %s1261_s23   ;;  %s1261_s23 = sphi %s1308_s23, %s19_s23   ;;  %s1257_s22 = sphi %s1306_s22, %s1639_s22   ;;  %s1253_s21 = sphi %s1304_s21, %s1638_s21   ;;  %s1249_s20 = sphi %s1302_s20, %s1637_s20   ;;  %s1245_s19 = sphi %s1300_s19, %s1636_s19   ;;  %s1241_s18 = sphi %s1298_s18, %s1635_s18  }
   0x6   : > { %s31_s26 = sadd.s32 1, %s1257_s22  ;;  %s150_s27 = sadd.s32 1, %s1249_s20 }
   0x7   : > { %p33_p0 = scmp.ge.s32.totalorder %s31_s26, 2  ;;  %p160_p1 = scmp.ne.s32.totalorder %s1249_s20, %s1245_s19 }
   0x8   : > { %p161_p2 = scmp.eq.s32.totalorder %s899_s24, 1  ;;  %p166_p3 = scmp.ne.s32.totalorder %s1245_s19, %s1241_s18 }
   0x9   : > { %s1641_s26 = smov (%p33_p0, %s31_s26), 0  ;;  %p167_p5 = scmp.eq.s32.totalorder %s900_s25, 1 }
   0xa   : > { %p1338_p4 = por %p161_p2, %p160_p1  ;;  %s145_s29 = ssub.s32 %s1257_s22, %s1641_s26 }
   0xb   : > { %p901_p6 = scmp.ge.s32.totalorder %s1261_s23, 1  ;;  %p148_p7 = scmp.eq.s32.totalorder %s145_s29, 0 }
   0xc   : > { %p1345_p8 = por %p167_p5, %p166_p3  ;;  %p174_p9 = scmp.lt.s32.totalorder %s1261_s23, 3 }
   0xd   : > { %s1351_s6 = scalar_select %p148_p7, %s1249_s20, %s150_s27  }
   0xe   : > { %p175_p10 = pnand %p901_p6, %p174_p9  ;;  %p1075_p11 = scmp.eq.s32.totalorder %s899_s24, 0 }
   0xf   : > { %s191_s9 = sshll.u32 %s1630_s3, 4  ;;  %s1263_s10 = smov [#allocation2]   ;;  %s192_s9 = int_to_ptr.hbm [resolvable:$true] %s191_s9 }
  0x10   : > { %p1067_p12 = pneg %p175_p10  ;;  %s193_s11 = sshll.u32 %s1263_s10, 4  ;;  %s194_s11 = int_to_ptr.vmem [resolvable:$true] %s193_s11 }
  0x11   : > { %s1264_s12 = smov 64   ;;  %s1265_s13 = smov 4  }
  0x12   : > { %p1068_p13 = pnand %p1075_p11, %p1067_p12  ;;  %220 = sbr.rel (%p175_p10) target bundleno = 572 (0x23c), region = 40 }
  0x14   : > { %1070 = dma.hbm_to_vmem [thread:$0]  (!%p1068_p13), %s192_s9, 1024, %s194_s11, [#allocation3], %s1264_s12, %s1264_s12, %s1265_s13  }
  0x17   : > { %1232 = dma.done.wait (%p1075_p11), [#allocation3], 1024  }
  0x18   : > { %1234 = vsyncadd (%p1075_p11), [#allocation3], 4294966272  ;;  %p249_p0 = scmp.lt.s32.totalorder %s1253_s21, 1  ;;  %v933_v0 = vld [vmem:[%s1629_s2 + $0x30] sm:$0xf]  ;;  %vm370_vm1 = vcmask 523264  }
  0x19   : > { %v1041_v1 = vld [vmem:[%s1629_s2 + $0x34] sm:$0xf0]  ;;  %v1040_v2 = vld [vmem:[%s1629_s2 + $0x34] sm:$0xf]  ;;  %v935_v4 = vld [vmem:[%s1629_s2 + $0x38] sm:$0xf0] }
  0x1a   : > { %s250_s14 = scalar_select %p249_p0, %s1253_s21, 1  ;;  %v934_v3 = vor.u32 %v1041_v1, %v933_v0  ;;  %v925_v5 = vld [vmem:[%s1629_s2 + $0x20] sm:$0xf]  ;;  %v1039_v6 = vld [vmem:[%s1629_s2 + $0x24] sm:$0xf0]  ;;  %v938_v7 = vor.u32 %v1040_v2, %v935_v4 }
  0x1b   : > { %v1038_v8 = vld [vmem:[%s1629_s2 + $0x24] sm:$0xf]  ;;  %v927_v9 = vld [vmem:[%s1629_s2 + $0x28] sm:$0xf0]  ;;  %v926_v10 = vor.u32 %v1039_v6, %v925_v5  ;;  %v917_v12 = vld [vmem:[%s1629_s2 + $0x10] sm:$0xf] }
  0x1c   : > { %s1059_s15 = smul.u32 80, %s250_s14  ;;  %1050 = vmatpush.bf16.msra.mxu2 %v934_v3  ;;  %390 = vmatpush.bf16.msra.mxu0 %v934_v3  ;;  %v930_v11 = vor.u32 %v1038_v8, %v927_v9  ;;  %v1037_v13 = vld [vmem:[%s1629_s2 + $0x14] sm:$0xf0]  ;;  %v1036_v14 = vld [vmem:[%s1629_s2 + $0x14] sm:$0xf]  ;;  %s246_s12 = sand.u32 1, %s1245_s19  }
  0x1d   : > { %1054 = vmatpush.bf16.msra.mxu3 %v938_v7  ;;  %423 = vmatpush.bf16.msra.mxu1 %v938_v7  ;;  %v919_v15 = vld [vmem:[%s1629_s2 + $0x18] sm:$0xf0]  ;;  %v918_v22 = vor.u32 %v1037_v13, %v917_v12  ;;  %v909_v23 = vld [vmem:[%s1629_s2] sm:$0xf]  ;;  %v1035_v24 = vld [vmem:[%s1629_s2 + $0x4] sm:$0xf0] }
  0x1e   : > { %s1385_s27 = scalar_lea.vmem %s1627_s0, %s1059_s15  ;;  %v922_v27 = vor.u32 %v1036_v14, %v919_v15  ;;  %v1034_v28 = vld [vmem:[%s1629_s2 + $0x4] sm:$0xf]  ;;  %v911_v29 = vld [vmem:[%s1629_s2 + $0x8] sm:$0xf0]  ;;  %v975_v35 = vld [vmem:[%s1628_s1 + $0x30] sm:$0xf]  ;;  %v910_v41 = vor.u32 %v1035_v24, %v909_v23 }
  0x1f   : > { %v262_v16 = vld [vmem:[%s1385_s27 + $0x20] sm:$0xff]  ;;  %v263_v17 = vld [vmem:[%s1385_s27 + $0x28] sm:$0xff]  ;;  %v264_v18 = vld [vmem:[%s1385_s27 + $0x30] sm:$0xff]  ;;  %vm290_vm0 = vsmask.f32 7424  ;;  %v914_v43 = vor.u32 %v1034_v28, %v911_v29  ;;  %s1058_s13 = smul.u32 72, %s246_s12 }
  0x20   : > { %v265_v19 = vld [vmem:[%s1385_s27 + $0x38] sm:$0xff]  ;;  %v1403_v20 = vpack.c.bf16 %v263_v17, %v262_v16  ;;  %v1406_v21 = vld [vmem:[%s1385_s27 + $0x40] sm:$0xff]  ;;  %1051 = vmatpush.bf16.msra.mxu2 %v926_v10  ;;  %v267_v26 = vld [vmem:[%s1385_s27 + $0x48] sm:$0xff]  ;;  %391 = vmatpush.bf16.msra.mxu0 %v926_v10  ;;  %s1060_s16 = smul.u32 72, %s1253_s21  ;;  %s795_s8 = scalar_lea.sflag [#allocation4], %s246_s12 }
  0x21   : > { %v1414_v25 = vpack.c.bf16 %v265_v19, %v264_v18  ;;  %1055 = vmatpush.bf16.msra.mxu3 %v930_v11  ;;  %v1426_v32 = vpack.c.bf16 %v267_v26, %v1406_v21  ;;  %424 = vmatpush.bf16.msra.mxu1 %v930_v11  ;;  %v1033_v36 = vld [vmem:[%s1628_s1 + $0x34] sm:$0xf0]  ;;  %v1032_v39 = vld [vmem:[%s1628_s1 + $0x34] sm:$0xf]  ;;  %v977_v40 = vld [vmem:[%s1628_s1 + $0x38] sm:$0xf0]  ;;  %v272_v26 = vpack.c.bf16 %v1406_v21, %v1406_v21 }
  0x22   : > { %v307_v30 = vshll.u32 %v1403_v20, 16  ;;  %v311_v31 = vshrl.u32 %v1403_v20, 16  ;;  %v976_v46 = vor.u32 %v1033_v36, %v975_v35  ;;  %v967_v48 = vld [vmem:[%s1628_s1 + $0x20] sm:$0xf]  ;;  %v1031_v49 = vld [vmem:[%s1628_s1 + $0x24] sm:$0xf0]  ;;  %v980_v50 = vor.u32 %v1032_v39, %v977_v40  ;;  %s808_s25 = scalar_lea.hbm %s1632_s5, %s1060_s16 }
  0x23   : > { %v315_v33 = vshll.u32 %v1414_v25, 16  ;;  %v319_v34 = vshrl.u32 %v1414_v25, 16  ;;  %v323_v38 = vshll.u32 %v1426_v32, 16  ;;  %v1030_v51 = vld [vmem:[%s1628_s1 + $0x24] sm:$0xf]  ;;  %v968_v55 = vor.u32 %v1031_v49, %v967_v48  ;;  %v259_v57 = vld [vmem:[%s1385_s27 + $0x8] sm:$0xff] }
  0x24   : > { %v1436_v37 = vrot.slane %v307_v30, 1  ;;  %1052 = vmatpush.bf16.msra.mxu2 %v918_v22  ;;  %392 = vmatpush.bf16.msra.mxu0 %v918_v22  ;;  %v969_v52 = vld [vmem:[%s1628_s1 + $0x28] sm:$0xf0]  ;;  %v258_v56 = vld [vmem:[%s1385_s27] sm:$0xff]  ;;  %v959_v59 = vld [vmem:[%s1628_s1 + $0x10] sm:$0xf] }
  0x25   : > { %v317_v42 = vrot.slane %v315_v33, 1  ;;  %1056 = vmatpush.bf16.msra.mxu3 %v922_v27  ;;  %v325_v45 = vrot.slane %v323_v38, 1  ;;  %425 = vmatpush.bf16.msra.mxu1 %v922_v27  ;;  %v972_v58 = vor.u32 %v1030_v51, %v969_v52  ;;  %v1029_v60 = vld [vmem:[%s1628_s1 + $0x14] sm:$0xf0]  ;;  %v1028_v61 = vld [vmem:[%s1628_s1 + $0x14] sm:$0xf]  ;;  %v268_v63 = vpack.c.bf16 %v259_v57, %v258_v56 }
  0x26   : > { %v313_v44 = vor.u32 %v311_v31, %v1436_v37  ;;  %v961_v62 = vld [vmem:[%s1628_s1 + $0x18] sm:$0xf0]  ;;  %v260_v0 = vld [vmem:[%s1385_s27 + $0x10] sm:$0xff]  ;;  %v960_v1 = vor.u32 %v1029_v60, %v959_v59  ;;  %v951_v6 = vld [vmem:[%s1628_s1] sm:$0xf]  ;;  %v327_v17 = vshrl.u32 %v1426_v32, 16 }
  0x27   : > { %v321_v47 = vor.u32 %v319_v34, %v317_v42  ;;  %v261_v2 = vld [vmem:[%s1385_s27 + $0x18] sm:$0xff]  ;;  %v292_v3 = vshrl.u32 %v268_v63, 16  ;;  %v294_v4 = vshll.u32 %v268_v63, 16  ;;  %v964_v5 = vor.u32 %v1028_v61, %v961_v62  ;;  %v1027_v7 = vld [vmem:[%s1628_s1 + $0x4] sm:$0xf0]  ;;  %v1046_v32 = vld [vmem:[#allocation2 + $0x20] sm:$0xff] }
  0x28   : > { %1053 = vmatpush.bf16.msra.mxu2 %v910_v41  ;;  %v318_v53 = vsel %vm290_vm0, %v313_v44, %v317_v42  ;;  %393 = vmatpush.bf16.msra.mxu0 %v910_v41  ;;  %v269_v8 = vpack.c.bf16 %v261_v2, %v260_v0  ;;  %v1026_v9 = vld [vmem:[%s1628_s1 + $0x4] sm:$0xf]  ;;  %v953_v10 = vld [vmem:[%s1628_s1 + $0x8] sm:$0xf0]  ;;  %v952_v13 = vor.u32 %v1027_v7, %v951_v6  ;;  %v1049_v29 = vld [vmem:[#allocation2 + $0x38] sm:$0xff]  ;;  %s248_s14 = scalar_lea.vmem [#allocation5], %s1058_s13 }
  0x29   : > { %1057 = vmatpush.bf16.msra.mxu3 %v914_v43  ;;  %v326_v54 = vsel %vm290_vm0, %v321_v47, %v325_v45  ;;  %426 = vmatpush.bf16.msra.mxu1 %v914_v43  ;;  %v296_v11 = vrot.slane %v294_v4, 1  ;;  %v956_v15 = vor.u32 %v1026_v9, %v953_v10  ;;  %v329_v19 = vor.u32 %v327_v17, %v325_v45  ;;  %v1047_v21 = vld [vmem:[#allocation2 + $0x28] sm:$0xff]  ;;  %v1045_v34 = vld [vmem:[#allocation2 + $0x18] sm:$0xff]  ;;  %v1044_v35 = vld [vmem:[#allocation2 + $0x10] sm:$0xff]  ;;  %s809_s29 = sshll.u32 %s248_s14, 4  ;;  %s811_s7 = sshll.u32 %s808_s25, 4  ;;  %s810_s29 = int_to_ptr.vmem [resolvable:$true] %s809_s29  ;;  %s812_s7 = int_to_ptr.hbm [resolvable:$true] %s811_s7 }
  0x2a   : > { %v299_v12 = vshll.u32 %v269_v8, 16  ;;  %v303_v22 = vshrl.u32 %v269_v8, 16  ;;  %v1043_v38 = vld [vmem:[#allocation2 + $0x8] sm:$0xff]  ;;  %v1042_v39 = vld [vmem:[#allocation2] sm:$0xff]  ;;  %s1193_s9 = sshra.s32 %s812_s7, 4  ;;  %s1199_s27 = scalar_lea.hbm %s1632_s5, 144  ;;  %s1194_s9 = int_to_ptr.hbm [resolvable:$true] %s1193_s9 }
  0x2b   : > { %941 = vmatmul.msk.bf16.vlgmr.msra.gmra.mxu2 %vm370_vm1, %v318_v53  ;;  %v297_v14 = vor.u32 %v296_v11, %v292_v3  ;;  %s1195_s15 = scalar_lea.hbm %s1194_s9, 72  ;;  %p1200_p5 = scmp.lt.s32.totalorder %s1194_s9, %s1632_s5 }
  0x2c   : > { %507 = vmatpush.bf16.msrb.mxu2 %v976_v46  ;;  %947 = vmatmul.msk.bf16.vlgmr.msra.gmra.mxu3 %vm370_vm1, %v326_v54  ;;  %v301_v16 = vrot.slane %v299_v12, 1  ;;  %p1196_p1 = scmp.ne.s32.totalorder %s1194_s9, %s1195_s15  ;;  %p1201_p6 = scmp.lt.s32.totalorder %s1199_s27, %s1195_s15 }
  0x2d   : > { %540 = vmatpush.bf16.msrb.mxu3 %v980_v50  ;;  %665 = vmatpush.bf16.msrb.mxu0 %v1049_v29 }
  0x2e   : > { %v302_v18 = vsel %vm290_vm0, %v297_v14, %v301_v16  ;;  %v305_v23 = vor.u32 %v303_v22, %v301_v16  ;;  %p1197_p2 = pnand %p1196_p1, %p1338_p4  ;;  %p1202_p7 = por %p1201_p6, %p1200_p5 }
  0x2f   : > { %939 = vmatmul.msk.bf16.vlgmr.msra.gmra.mxu0 %vm370_vm1, %v302_v18  ;;  %944 = vmatmul.msk.bf16.vlgmr.msra.gmra.mxu1 %vm370_vm1, %v302_v18 }
  0x30   : > { %508 = vmatpush.bf16.msrb.mxu2 %v968_v55  ;;  %v310_v24 = vsel %vm290_vm0, %v305_v23, %v1436_v37  ;;  %p1198_p3 = pneg %p1197_p2 }
  0x31   : > { %541 = vmatpush.bf16.msrb.mxu3 %v972_v58 }
  0x32   : > { %p1203_p9 = pnand %p1202_p7, %p1198_p3 }
  0x34   : > { %509 = vmatpush.bf16.msrb.mxu2 %v960_v1 }
  0x35   : > { %542 = vmatpush.bf16.msrb.mxu3 %v964_v5 }
  0x38   : > { %510 = vmatpush.bf16.msrb.mxu2 %v952_v13 }
  0x39   : > { %543 = vmatpush.bf16.msrb.mxu3 %v956_v15 }
  0x3b   : > { %942 = vmatmul.msk.bf16.gmra.mxu2 %vm370_vm1, %v326_v54 }
  0x3c   : > { %948 = vmatmul.msk.bf16.gmra.mxu3 %vm370_vm1, %v329_v19 }
  0x3f   : > { %940 = vmatmul.msk.bf16.gmra.mxu0 %vm370_vm1, %v310_v24  ;;  %945 = vmatmul.msk.bf16.gmra.mxu1 %vm370_vm1, %v310_v24 }
  0x4b   : > { %943 = vmatmul.msk.bf16.gmra.mxu2 %vm370_vm1, %v329_v19 }
  0x4c   : > { %986 = vmatmul.msk.bf16.vlgmr.msrb.gmra.mxu3 %vm370_vm1, %v268_v63 }
  0x4f   : > { %946 = vmatmul.msk.bf16.gmra.mxu1 %vm370_vm1, %v318_v53 }
  0x5b   : > { %981 = vmatmul.msk.bf16.vlgmr.msrb.gmra.mxu2 %vm370_vm1, %v268_v63 }
  0x5c   : > { %987 = vmatmul.msk.bf16.gmra.mxu3 %vm370_vm1, %v269_v8 }
  0x6b   : > { %982 = vmatmul.msk.bf16.gmra.mxu2 %vm370_vm1, %v269_v8 }
  0x6c   : > { %988 = vmatmul.msk.bf16.gmra.mxu3 %vm370_vm1, %v1403_v20 }
  0x7b   : > { %983 = vmatmul.msk.bf16.gmra.mxu2 %vm370_vm1, %v1403_v20  ;;  %v1048_v20 = vld [vmem:[#allocation2 + $0x30] sm:$0xff] }
  0x7c   : > { %989 = vmatmul.msk.bf16.gmra.mxu3 %vm370_vm1, %v1414_v25  ;;  %666 = vmatpush.bf16.msrb.mxu0 %v1048_v20 }
  0x80   : > { %667 = vmatpush.bf16.msrb.mxu0 %v1047_v21 }
  0x84   : > { %668 = vmatpush.bf16.msrb.mxu0 %v1046_v32 }
  0x88   : > { %669 = vmatpush.bf16.msrb.mxu0 %v1045_v34 }
  0x8b   : > { %984 = vmatmul.msk.bf16.gmra.mxu2 %vm370_vm1, %v1414_v25 }
  0x8c   : > { %990 = vmatmul.msk.bf16.gmra.mxu3 %vm370_vm1, %v272_v26  ;;  %670 = vmatpush.bf16.msrb.mxu0 %v1044_v35 }
  0x90   : > { %671 = vmatpush.bf16.msrb.mxu0 %v1043_v38 }
  0x94   : > { %672 = vmatpush.bf16.msrb.mxu0 %v1042_v39 }
  0x9b   : > { %985 = vmatmul.msk.bf16.gmra.mxu2 %vm370_vm1, %v272_v26 }
  0xac   : > { %v428_v42 = vpop.f32.mrf.mxu1  ;;  %v395_v45 = vpop.f32.mrf.mxu0 }
  0xae   : > { %v1518_v27 = vpop.f32.mrf.mxu2 }
  0xaf   : > { %v1520_v28 = vpop.f32.mrf.mxu3 }
  0xb4   : > { %v430_v46 = vpop.f32.mrf.mxu1  ;;  %v397_v49 = vpop.f32.mrf.mxu0 }
  0xb6   : > { %v1522_v30 = vpop.f32.mrf.mxu2 }
  0xb7   : > { %v1524_v31 = vpop.f32.mrf.mxu3 }
  0xbc   : > { %v433_v52 = vpop.f32.mrf.mxu1  ;;  %v400_v63 = vpop.f32.mrf.mxu0 }
  0xbe   : > { %v1526_v25 = vpop.f32.mrf.mxu2 }
  0xbf   : > { %v1528_v33 = vpop.f32.mrf.mxu3 }
  0xc4   : > { %v435_v1 = vpop.f32.mrf.mxu1  ;;  %v402_v7 = vpop.f32.mrf.mxu0 }
  0xc6   : > { %v1530_v36 = vpop.f32.mrf.mxu2 }
  0xc7   : > { %v450_v37 = vpop.f32.mrf.mxu3 }
  0xcc   : > { %v438_v13 = vpop.f32.mrf.mxu1 }
  0xce   : > { %v1532_v40 = vpop.f32.mrf.mxu2 }
  0xcf   : > { %v545_v41 = vpop.f32.mrf.mxu3 }
  0xd0   : > { %v546_v50 = vadd.f32 %v545_v41, %v428_v42 }
  0xd2   : > { %v578_v55 = vmul.f32 %v546_v50, %v546_v50  ;;  %v736_v50 = vld [vmem:[%s1631_s4 + $0x58] sm:$0xff] }
  0xd4   : > { %v440_v23 = vpop.f32.mrf.mxu1 }
  0xd6   : > { %v417_v43 = vpop.f32.mrf.mxu2 }
  0xd7   : > { %v547_v44 = vpop.f32.mrf.mxu3 }
  0xd8   : > { %v548_v53 = vadd.f32 %v547_v44, %v430_v46 }
  0xda   : > { %v579_v59 = vmul.f32 %v548_v53, %v548_v53 }
  0xde   : > { %v512_v47 = vpop.f32.mrf.mxu2 }
  0xdf   : > { %v550_v48 = vpop.f32.mrf.mxu3  ;;  %v513_v51 = vadd.f32 %v512_v47, %v395_v45  ;;  %v740_v45 = vld [vmem:[%s1631_s4 + $0x78] sm:$0xff]  ;;  %v737_v47 = vld [vmem:[%s1631_s4 + $0x60] sm:$0xff] }
  0xe0   : > { %v551_v4 = vadd.f32 %v550_v48, %v433_v52  ;;  %741 = vmatpush.msrb.mxu1 %v740_v45 }
  0xe1   : > { %v569_v56 = vmul.f32 %v513_v51, %v513_v51 }
  0xe2   : > { %v580_v9 = vmul.f32 %v551_v4, %v551_v4 }
  0xe3   : > { %v587_v61 = vadd.f32 %v578_v55, %v569_v56 }
  0xe6   : > { %v514_v54 = vpop.f32.mrf.mxu2 }
  0xe7   : > { %v515_v57 = vadd.f32 %v514_v54, %v397_v49  ;;  %v552_v58 = vpop.f32.mrf.mxu3 }
  0xe8   : > { %v553_v6 = vadd.f32 %v552_v58, %v435_v1 }
  0xe9   : > { %v570_v60 = vmul.f32 %v515_v57, %v515_v57 }
  0xea   : > { %v581_v14 = vmul.f32 %v553_v6, %v553_v6 }
  0xeb   : > { %v588_v62 = vadd.f32 %v579_v59, %v570_v60  ;;  %v732_v60 = vld [vmem:[%s1631_s4 + $0x38] sm:$0xff] }
  0xed   : > { %v596_v0 = vpack.c.bf16 %v588_v62, %v587_v61  ;;  %v731_v62 = vld [vmem:[%s1631_s4 + $0x30] sm:$0xff] }
  0xee   : > { %v517_v2 = vpop.f32.mrf.mxu2 }
  0xef   : > { %v555_v3 = vpop.f32.mrf.mxu3  ;;  %673 = vmatmul.bf16.vlgmr.msrb.gmra.mxu0 %v596_v0  ;;  %v518_v5 = vadd.f32 %v517_v2, %v400_v63  ;;  %v730_v0 = vld [vmem:[%s1631_s4 + $0x28] sm:$0xff]  ;;  %v729_v2 = vld [vmem:[%s1631_s4 + $0x20] sm:$0xff] }
  0xf0   : > { %v556_v24 = vadd.f32 %v555_v3, %v438_v13 }
  0xf1   : > { %v571_v10 = vmul.f32 %v518_v5, %v518_v5 }
  0xf2   : > { %v582_v21 = vmul.f32 %v556_v24, %v556_v24 }
  0xf3   : > { %v589_v16 = vadd.f32 %v580_v9, %v571_v10  ;;  %v725_v9 = vld [vmem:[%s1631_s4] sm:$0xff] }
  0xf6   : > { %v519_v8 = vpop.f32.mrf.mxu2 }
  0xf7   : > { %v520_v11 = vadd.f32 %v519_v8, %v402_v7  ;;  %v557_v12 = vpop.f32.mrf.mxu3  ;;  %v726_v8 = vld [vmem:[%s1631_s4 + $0x8] sm:$0xff] }
  0xf8   : > { %v558_v29 = vadd.f32 %v557_v12, %v440_v23 }
  0xf9   : > { %v572_v15 = vmul.f32 %v520_v11, %v520_v11 }
  0xfa   : > { %v583_v37 = vmul.f32 %v558_v29, %v558_v29 }
  0xfb   : > { %v590_v17 = vadd.f32 %v581_v14, %v572_v15 }
  0xfd   : > { %v597_v18 = vpack.c.bf16 %v590_v17, %v589_v16 }
  0xfe   : > { %v522_v19 = vpop.f32.mrf.mxu2 }
  0xff   : > { %v560_v22 = vpop.f32.mrf.mxu3  ;;  %678 = vmatmul.bf16.gmra.mxu0 %v597_v18  ;;  %v523_v26 = vadd.f32 %v522_v19, %v1518_v27  ;;  %v739_v27 = vld [vmem:[%s1631_s4 + $0x70] sm:$0xff] }
 0x100   : > { %742 = vmatpush.msrb.mxu1 %v739_v27  ;;  %v561_v48 = vadd.f32 %v560_v22, %v1520_v28 }
 0x101   : > { %v573_v32 = vmul.f32 %v523_v26, %v523_v26 }
 0x102   : > { %v584_v55 = vmul.f32 %v561_v48, %v561_v48 }
 0x103   : > { %v591_v39 = vadd.f32 %v582_v21, %v573_v32 }
 0x106   : > { %v524_v20 = vpop.f32.mrf.mxu2 }
 0x107   : > { %v525_v34 = vadd.f32 %v524_v20, %v1522_v30  ;;  %v562_v35 = vpop.f32.mrf.mxu3  ;;  %v738_v30 = vld [vmem:[%s1631_s4 + $0x68] sm:$0xff] }
 0x108   : > { %743 = vmatpush.msrb.mxu1 %v738_v30  ;;  %v563_v49 = vadd.f32 %v562_v35, %v1524_v31  ;;  %v734_v31 = vld [vmem:[%s1631_s4 + $0x48] sm:$0xff] }
 0x109   : > { %v574_v38 = vmul.f32 %v525_v34, %v525_v34 }
 0x10a   : > { %744 = vmatpush.msrb.mxu1 %v737_v47  ;;  %v585_v56 = vmul.f32 %v563_v49, %v563_v49 }
 0x10b   : > { %v592_v41 = vadd.f32 %v583_v37, %v574_v38 }
 0x10c   : > { %745 = vmatpush.msrb.mxu1 %v736_v50 }
 0x10d   : > { %v598_v42 = vpack.c.bf16 %v592_v41, %v591_v39 }
 0x10e   : > { %v527_v43 = vpop.f32.mrf.mxu2 }
 0x10f   : > { %v565_v44 = vpop.f32.mrf.mxu3  ;;  %683 = vmatmul.bf16.gmra.mxu0 %v598_v42  ;;  %v528_v46 = vadd.f32 %v527_v43, %v1526_v25  ;;  %v735_v25 = vld [vmem:[%s1631_s4 + $0x50] sm:$0xff] }
 0x110   : > { %746 = vmatpush.msrb.mxu1 %v735_v25  ;;  %v566_v1 = vadd.f32 %v565_v44, %v1528_v33  ;;  %v727_v33 = vld [vmem:[%s1631_s4 + $0x10] sm:$0xff] }
 0x111   : > { %v575_v52 = vmul.f32 %v528_v46, %v528_v46 }
 0x112   : > { %747 = vmatpush.msrb.mxu1 %v734_v31  ;;  %v586_v5 = vmul.f32 %v566_v1, %v566_v1 }
 0x113   : > { %v593_v57 = vadd.f32 %v584_v55, %v575_v52 }
 0x116   : > { %v529_v51 = vpop.f32.mrf.mxu2 }
 0x117   : > { %v530_v53 = vadd.f32 %v529_v51, %v1530_v36  ;;  %v567_v54 = vpop.f32.mrf.mxu3  ;;  %v733_v36 = vld [vmem:[%s1631_s4 + $0x40] sm:$0xff] }
 0x118   : > { %748 = vmatpush.msrb.mxu1 %v733_v36 }
 0x119   : > { %v576_v28 = vmul.f32 %v530_v53, %v530_v53 }
 0x11a   : > { %749 = vmatpush.msrb.mxu1 %v732_v60 }
 0x11b   : > { %v594_v58 = vadd.f32 %v585_v56, %v576_v28 }
 0x11c   : > { %750 = vmatpush.msrb.mxu1 %v731_v62 }
 0x11d   : > { %v599_v59 = vpack.c.bf16 %v594_v58, %v593_v57 }
 0x11e   : > { %v532_v61 = vpop.f32.mrf.mxu2  ;;  %751 = vmatpush.msrb.mxu1 %v730_v0 }
 0x11f   : > { %688 = vmatmul.bf16.gmra.mxu0 %v599_v59  ;;  %v533_v63 = vadd.f32 %v532_v61, %v1532_v40  ;;  %v728_v40 = vld [vmem:[%s1631_s4 + $0x18] sm:$0xff] }
 0x120   : > { %752 = vmatpush.msrb.mxu1 %v729_v2 }
 0x121   : > { %v577_v3 = vmul.f32 %v533_v63, %v533_v63 }
 0x122   : > { %753 = vmatpush.msrb.mxu1 %v728_v40 }
 0x123   : > { %v595_v6 = vadd.f32 %v586_v5, %v577_v3 }
 0x124   : > { %754 = vmatpush.msrb.mxu1 %v727_v33 }
 0x125   : > { %v600_v7 = vpack.c.bf16 %v595_v6, %v595_v6 }
 0x126   : > { %v534_v4 = vpop.f32.mrf.mxu2  ;;  %755 = vmatpush.msrb.mxu1 %v726_v8 }
 0x128   : > { %756 = vmatpush.msrb.mxu1 %v725_v9 }
 0x12f   : > { %693 = vmatmul.bf16.gmra.mxu0 %v600_v7 }
 0x16c   : > { %v674_v10 = vpop.f32.mrf.mxu0 }
 0x16d   : > { %v675_v11 = vadd.f32 1.1920929e-07, %v674_v10 }
 0x16f   : > { %1131 = vlog2.f32 %v675_v11 }
 0x174   : > { %v676_v12 = vpop.f32.mrf.mxu0 }
 0x175   : > { %v1132_v13 = vpop.eup %1131  ;;  %v677_v14 = vadd.f32 1.1920929e-07, %v676_v12 }
 0x176   : > { %v699_v15 = vmul.f32 0.6931472, %v1132_v13 }
 0x177   : > { %1133 = vlog2.f32 %v677_v14 }
 0x178   : > { %v716_v16 = vmul.f32 0.4342945, %v699_v15 }
 0x17a   : > { %757 = vmatmul.f32.vlgmr.msrb.gmra.mxu1 %v716_v16 }
 0x17c   : > { %v679_v17 = vpop.f32.mrf.mxu0 }
 0x17d   : > { %v1134_v18 = vpop.eup %1133  ;;  %v680_v19 = vadd.f32 1.1920929e-07, %v679_v17 }
 0x17e   : > { %v701_v22 = vmul.f32 0.6931472, %v1134_v18 }
 0x17f   : > { %1135 = vlog2.f32 %v680_v19 }
 0x180   : > { %v717_v23 = vmul.f32 0.4342945, %v701_v22 }
 0x182   : > { %760 = vmatmul.f32.gmra.mxu1 %v717_v23 }
 0x184   : > { %v681_v24 = vpop.f32.mrf.mxu0 }
 0x185   : > { %v1136_v26 = vpop.eup %1135  ;;  %v682_v29 = vadd.f32 1.1920929e-07, %v681_v24 }
 0x186   : > { %v703_v20 = vmul.f32 0.6931472, %v1136_v26 }
 0x187   : > { %1137 = vlog2.f32 %v682_v29 }
 0x188   : > { %v718_v21 = vmul.f32 0.4342945, %v703_v20 }
 0x18a   : > { %763 = vmatmul.f32.gmra.mxu1 %v718_v21 }
 0x18c   : > { %v684_v32 = vpop.f32.mrf.mxu0 }
 0x18d   : > { %v1138_v34 = vpop.eup %1137  ;;  %v685_v35 = vadd.f32 1.1920929e-07, %v684_v32 }
 0x18e   : > { %v705_v37 = vmul.f32 0.6931472, %v1138_v34 }
 0x18f   : > { %1139 = vlog2.f32 %v685_v35 }
 0x190   : > { %v719_v38 = vmul.f32 0.4342945, %v705_v37 }
 0x192   : > { %766 = vmatmul.f32.gmra.mxu1 %v719_v38 }
 0x194   : > { %v686_v39 = vpop.f32.mrf.mxu0 }
 0x195   : > { %v1140_v41 = vpop.eup %1139  ;;  %v687_v42 = vadd.f32 1.1920929e-07, %v686_v39 }
 0x196   : > { %v707_v43 = vmul.f32 0.6931472, %v1140_v41 }
 0x197   : > { %1141 = vlog2.f32 %v687_v42 }
 0x198   : > { %v720_v44 = vmul.f32 0.4342945, %v707_v43 }
 0x19a   : > { %769 = vmatmul.f32.gmra.mxu1 %v720_v44 }
 0x19c   : > { %v689_v45 = vpop.f32.mrf.mxu0 }
 0x19d   : > { %v1142_v27 = vpop.eup %1141  ;;  %v690_v30 = vadd.f32 1.1920929e-07, %v689_v45 }
 0x19e   : > { %v709_v46 = vmul.f32 0.6931472, %v1142_v27 }
 0x19f   : > { %1143 = vlog2.f32 %v690_v30 }
 0x1a0   : > { %v721_v47 = vmul.f32 0.4342945, %v709_v46 }
 0x1a2   : > { %772 = vmatmul.f32.gmra.mxu1 %v721_v47 }
 0x1a4   : > { %v691_v48 = vpop.f32.mrf.mxu0 }
 0x1a5   : > { %v1144_v49 = vpop.eup %1143  ;;  %v692_v50 = vadd.f32 1.1920929e-07, %v691_v48 }
 0x1a6   : > { %v711_v51 = vmul.f32 0.6931472, %v1144_v49 }
 0x1a7   : > { %1145 = vlog2.f32 %v692_v50 }
 0x1a8   : > { %v722_v52 = vmul.f32 0.4342945, %v711_v51 }
 0x1aa   : > { %775 = vmatmul.f32.gmra.mxu1 %v722_v52 }
 0x1ac   : > { %v694_v53 = vpop.f32.mrf.mxu0 }
 0x1ad   : > { %v1146_v54 = vpop.eup %1145  ;;  %v695_v25 = vadd.f32 1.1920929e-07, %v694_v53 }
 0x1ae   : > { %v713_v55 = vmul.f32 0.6931472, %v1146_v54 }
 0x1af   : > { %1147 = vlog2.f32 %v695_v25 }
 0x1b0   : > { %v723_v56 = vmul.f32 0.4342945, %v713_v55 }
 0x1b2   : > { %778 = vmatmul.f32.gmra.mxu1 %v723_v56 }
 0x1b4   : > { %v696_v28 = vpop.f32.mrf.mxu0 }
 0x1b5   : > { %v1148_v31 = vpop.eup %1147 }
 0x1b6   : > { %v715_v57 = vmul.f32 0.6931472, %v1148_v31 }
 0x1b8   : > { %v724_v58 = vmul.f32 0.4342945, %v715_v57 }
 0x1ba   : > { %781 = vmatmul.f32.gmra.mxu1 %v724_v58 }
 0x1f7   : > { %v758_v36 = vpop.f32.mrf.mxu1 }
 0x1f8   : > { %785 = vst [vmem:[%s248_s14] sm:$0xff] %v758_v36 }
 0x1ff   : > { %v761_v59 = vpop.f32.mrf.mxu1 }
 0x200   : > { %786 = vst [vmem:[%s248_s14 + $0x8] sm:$0xff] %v761_v59 }
 0x207   : > { %v764_v60 = vpop.f32.mrf.mxu1 }
 0x208   : > { %787 = vst [vmem:[%s248_s14 + $0x10] sm:$0xff] %v764_v60 }
 0x20f   : > { %v767_v61 = vpop.f32.mrf.mxu1 }
 0x210   : > { %788 = vst [vmem:[%s248_s14 + $0x18] sm:$0xff] %v767_v61 }
 0x217   : > { %v770_v62 = vpop.f32.mrf.mxu1 }
 0x218   : > { %789 = vst [vmem:[%s248_s14 + $0x20] sm:$0xff] %v770_v62 }
 0x21f   : > { %v773_v63 = vpop.f32.mrf.mxu1 }
 0x220   : > { %790 = vst [vmem:[%s248_s14 + $0x28] sm:$0xff] %v773_v63 }
 0x227   : > { %v776_v0 = vpop.f32.mrf.mxu1 }
 0x228   : > { %791 = vst [vmem:[%s248_s14 + $0x30] sm:$0xff] %v776_v0 }
 0x22f   : > { %v779_v1 = vpop.f32.mrf.mxu1 }
 0x230   : > { %792 = vst [vmem:[%s248_s14 + $0x38] sm:$0xff] %v779_v1 }
 0x237   : > { %v782_v2 = vpop.f32.mrf.mxu1 }
 0x238   : > { %793 = vst [vmem:[%s248_s14 + $0x40] sm:$0xff] %v782_v2 }
 0x239   : > { %1206 = shalt.err (!%p1203_p9)
}
 0x23a   : > { %s1266_s12 = smov 128   ;;  %s1267_s14 = smov 8  }
 0x23b   : > { %1065 = dma.vmem_to_hbm [thread:$0]  (%p1338_p4), %s810_s29, 1152, %s812_s7, %s795_s8, %s1266_s12, %s1266_s12, %s1267_s14  }
 0x23c PF: > { %p1077_p10 = scmp.ge.s32.totalorder %s1261_s23, 2  ;;  %s826_s16 = sand.u32 1, %s1241_s18  }
 0x23d   : > { %s827_s17 = scalar_lea.sflag [#allocation4], %s826_s16 }
 0x23e   : > { %p1072_p11 = pnand %p1077_p10, %p1345_p8 }
 0x240   : > { %p1073_p12 = pneg %p1072_p11 }
 0x242   : > { %1236 = dma.done.wait (%p1073_p12), %s827_s17, 1152  }
 0x243   : > { %1238 = vsyncadd (%p1073_p12), %s827_s17, 4294966144  ;;  %s19_s23 = sadd.s32 1, %s1261_s23   ;;  %s1635_s18 = smov %s1245_s19 }
 0x244   : > { %p16_p13 = scmp.ge.s32.totalorder %s19_s23, 4   ;;  %s1636_s19 = smov %s1249_s20 }
 0x245   : > { %s1637_s20 = smov %s1351_s6  ;;  %s1638_s21 = smov %s1257_s22 }
 0x246   : > { %s1639_s22 = smov %s1641_s26  ;;  %18 = sbr.rel (!%p16_p13) target bundleno = 5 (0x5), region = 81 }
 0x24b   :  { %833 = vsyncpa [#allocation3], 1 }
 0x24c   :  { %835 = vsyncpa [#allocation3 + $0x1], 1 }
 0x24d   :  { %836 = vsyncpa [#allocation4], 1 }
 0x24e   :  { %838 = vsyncpa [#allocation4 + $0x1], 1 }

</bundles_post_ra>
